<compile_context>
chip_gen: v6e
topology: v6e:2x2x1
jax: 0.10.0
libtpu: 0.0.40
codegen_flags: <defaults>
</compile_context>

<pallas_src>
import jax
import jax.numpy as jnp
from jax.experimental import pallas as pl
from jax.experimental.pallas import tpu as pltpu


# ---------------------------------------------------------------------------
# Kernels
# ---------------------------------------------------------------------------

def _pos_enc_kernel(x_ref, pos_ref, cls_ref, out_ref):
    # x_ref:   (bt, N*D)      patch embeddings for bt batch rows (flattened)
    # pos_ref: (1,  N*D)      positional embedding, shared across batch (resident)
    # cls_ref: (1,  D)        CLS token, shared across batch (resident)
    # out_ref: (bt, (N+1)*D)  output rows: [cls | x + pos]
    bt = x_ref.shape[0]
    body = x_ref[...] + pos_ref[...]                      # VPU add, pos broadcasts over rows
    cls = jnp.broadcast_to(cls_ref[...], (bt, cls_ref.shape[1]))
    # Compose the full tile in registers -> single aligned, unmasked full-block store.
    # NOTE: when D % 128 != 0 the concat seam crosses a vreg lane boundary and costs
    # an XLU lane shift per output vreg; at HBM-bound this is hidden (XLU has slack).
    out_ref[...] = jnp.concatenate([cls, body], axis=-1)


def _add_rows_kernel(x_ref, pos_ref, out_ref):
    # Lane-tiled fallback: pure broadcast add on rows that were pre-padded with
    # a zero row (x) / the cls row (pos), so there is no concat seam at all.
    out_ref[...] = x_ref[...] + pos_ref[...]


# ---------------------------------------------------------------------------
# Block / VMEM sizing helpers
# ---------------------------------------------------------------------------

def _sublane_align(dtype):
    """Native sublane-tile row count for the dtype: 8 (f32), 16 (bf16), 32 (int8/fp8)."""
    return max(8, 32 // jnp.dtype(dtype).itemsize)


def _vmem_limit_bytes():
    """Generation-aware VMEM limit: ~3/4 of physical (48 MiB on v7x, 96 MiB on v5e/v6e)."""
    cap = 64 * 1024 * 1024  # v7x-safe default if the hardware query is unavailable
    try:
        info = pltpu.get_tpu_info()
        cap = int(getattr(info, "vmem_capacity_bytes", cap)) or cap
    except Exception:
        pass
    return min((cap * 3) // 4, 96 * 1024 * 1024)


def _pick_block_rows(batch, per_row_bytes, budget_bytes, align):
    """Largest legal batch-row block count bt with bt * per_row_bytes <= budget.

    Legal bt = a multiple of `align` (native sublane tile for the dtype) or the
    full batch.  Among fitting choices, prefer one whose grid length
    cdiv(batch, bt) is even so v7x's two TensorCores stay balanced; the grid uses
    cdiv so awkward (prime/odd) batch sizes never collapse to bt=1.
    """
    cdiv = lambda a, b: -(-a // b)
    rup = lambda a, b: cdiv(a, b) * b

    def legal(bt):
        return bt == batch or (bt >= align and bt % align == 0)

    def fits(bt):
        return bt * per_row_bytes <= budget_bytes

    best = None
    # Candidate 1: whole batch in one block.
    if fits(batch):
        best = batch
    # Candidate 2: largest aligned bt that fits.
    aligned_cap = (min(batch, budget_bytes // max(1, per_row_bytes)) // align) * align
    if aligned_cap >= align and fits(aligned_cap):
        best = aligned_cap if best is None else max(best, aligned_cap)
    if best is None:
        return 1  # caller routes huge-row cases to the lane-tiled fallback before here

    # Prefer an even grid length (keeps both v7x TensorCores busy / balanced).
    if batch > 1 and cdiv(batch, best) % 2 == 1:
        g = cdiv(batch, best) + 1          # next even grid length
        bt_even = cdiv(batch, g)
        for cand in (rup(bt_even, align), bt_even):   # aligned first, exact as last resort
            if 1 <= cand <= batch and legal(cand) and fits(cand) \
                    and cdiv(batch, cand) % 2 == 0:
                best = cand
                break
    return best


# ---------------------------------------------------------------------------
# Wrappers
# ---------------------------------------------------------------------------

def _positional_encoding_lane_tiled(x, pos_embed, cls2d, vmem_limit, align):
    """Fallback when a single flattened row (N+1)*D is too large for VMEM.

    Prepends a zero row to x and a [cls] row to pos, turning the whole op into a
    tiled broadcast add over [B, (N+1)*D] with 128-aligned column chunks.  Costs
    one extra pass over x (the pad copy); only used for very large N*D.
    """
    B, N, D = x.shape
    W = (N + 1) * D
    itemsize = jnp.dtype(x.dtype).itemsize

    posc = jnp.concatenate([cls2d.reshape(1, 1, D), pos_embed], axis=1)   # [1, N+1, D]
    x_pad = jnp.concatenate([jnp.zeros((B, 1, D), x.dtype), x], axis=1)   # [B, N+1, D]
    x2 = x_pad.reshape(B, W)
    p2 = posc.reshape(1, W)

    bt = B if B < align else align
    # live blocks: 2*(x + out) of (bt, ct) + 2 * pos of (1, ct)  <= vmem_limit / 2
    ct_max = (vmem_limit // 2) // ((4 * bt + 2) * itemsize)
    ct = min(W, max(128, (ct_max // 128) * 128))
    grid = (pl.cdiv(B, bt), pl.cdiv(W, ct))

    out2d = pl.pallas_call(
        _add_rows_kernel,
        out_shape=jax.ShapeDtypeStruct((B, W), x.dtype),
        grid_spec=pltpu.PrefetchScalarGridSpec(
            num_scalar_prefetch=0,
            grid=grid,
            in_specs=[
                pl.BlockSpec((bt, ct), lambda i, j: (i, j)),   # x rows / column chunk
                pl.BlockSpec((1, ct), lambda i, j: (0, j)),    # pos column chunk
            ],
            out_specs=pl.BlockSpec((bt, ct), lambda i, j: (i, j)),
        ),
        compiler_params=pltpu.CompilerParams(
            dimension_semantics=("parallel", "parallel"),
            vmem_limit_bytes=vmem_limit),
    )(x2, p2)
    return out2d.reshape(B, N + 1, D)


def positional_encoding_2d(x, patch_shape, time_embed, freq_embed, cls_token,
                           max_time_patches=32, max_freq_patches=8):
    """Pallas implementation of PositionalEncoding2D.forward."""
    B, N, D = x.shape
    time_patches, freq_patches = patch_shape
    time_patches = min(time_patches, max_time_patches)
    freq_patches = min(freq_patches, max_freq_patches)

    # --- glue (plain JAX): build pos_embed [1, N, D] exactly like the torch code ---
    # TODO(synk): for a static patch_shape this table is step-invariant; callers can
    # precompute it once outside the training step instead of rebuilding per forward.
    time_embed_needed = time_embed[:, :time_patches, :]              # [1, T, D//2]
    time_pos = jnp.tile(time_embed_needed, (1, freq_patches, 1))     # repeat(1, F, 1)
    freq_embed_needed = freq_embed[:, :freq_patches, :]              # [1, F, D//2]
    freq_pos = jnp.repeat(freq_embed_needed, time_patches, axis=1)   # repeat_interleave
    pos_embed = jnp.concatenate([time_pos, freq_pos], axis=-1)       # [1, T*F, D]

    actual_patches = min(N, pos_embed.shape[1])
    pos_embed = pos_embed[:, :actual_patches, :]
    if actual_patches < N:
        padding = jnp.zeros((1, N - actual_patches, D), dtype=pos_embed.dtype)
        pos_embed = jnp.concatenate([pos_embed, padding], axis=1)
    pos_embed = pos_embed.astype(x.dtype)
    cls2d = cls_token.reshape(1, D).astype(x.dtype)

    itemsize = jnp.dtype(x.dtype).itemsize
    align = _sublane_align(x.dtype)
    vmem_limit = _vmem_limit_bytes()

    # Real hot-path VMEM footprint per batch row: x + out blocks, each double-buffered,
    # plus the resident pos/cls blocks (counted x2 conservatively).  Keep the total
    # under half of vmem_limit.
    per_row_live = 2 * (N * D + (N + 1) * D) * itemsize
    resident = 2 * (N * D + D) * itemsize
    budget = vmem_limit // 2 - resident
    min_bt = B if B < align else align

    if budget < per_row_live * min_bt:
        # Even a single native-tile row block doesn't fit: lane-tiled fallback.
        return _positional_encoding_lane_tiled(x, pos_embed, cls2d, vmem_limit, align)

    bt = _pick_block_rows(B, per_row_live, budget, align)
    grid = (pl.cdiv(B, bt),)   # ragged final block handled by blocked indexing

    # --- lane-dense flattened views (free row-major reshapes) ---
    x2d = x.reshape(B, N * D)
    pos2d = pos_embed.reshape(1, N * D)

    cost = pl.CostEstimate(
        flops=B * N * D,
        transcendentals=0,
        bytes_accessed=(B * N * D + N * D + D + B * (N + 1) * D) * itemsize)

    out2d = pl.pallas_call(
        _pos_enc_kernel,
        out_shape=jax.ShapeDtypeStruct((B, (N + 1) * D), x.dtype),
        grid_spec=pltpu.PrefetchScalarGridSpec(
            num_scalar_prefetch=0,
            grid=grid,
            in_specs=[
                pl.BlockSpec((bt, N * D), lambda i: (i, 0)),        # x rows (streamed)
                pl.BlockSpec((1, N * D), lambda i: (0, 0)),         # pos: VMEM resident
                pl.BlockSpec((1, D), lambda i: (0, 0)),             # cls: VMEM resident
            ],
            out_specs=pl.BlockSpec((bt, (N + 1) * D), lambda i: (i, 0)),
        ),
        compiler_params=pltpu.CompilerParams(
            dimension_semantics=("parallel",),
            vmem_limit_bytes=vmem_limit),
        cost_estimate=cost,
    )(x2d, pos2d, cls2d)

    return out2d.reshape(B, N + 1, D)


# ---------------------------------------------------------------------------
# Pure-JAX reference (mirrors the PyTorch forward)
# ---------------------------------------------------------------------------

def _reference(x, patch_shape, time_embed, freq_embed, cls_token,
               max_time_patches=32, max_freq_patches=8):
    B, N, D = x.shape
    T, F = patch_shape
    T = min(T, max_time_patches)
    F = min(F, max_freq_patches)
    time_pos = jnp.tile(time_embed[:, :T, :], (1, F, 1))
    freq_pos = jnp.repeat(freq_embed[:, :F, :], T, axis=1)
    pos = jnp.concatenate([time_pos, freq_pos], axis=-1)
    actual = min(N, pos.shape[1])
    pos = pos[:, :actual, :]
    if actual < N:
        pos = jnp.concatenate([pos, jnp.zeros((1, N - actual, D), pos.dtype)], axis=1)
    x = x + pos
    cls = jnp.broadcast_to(cls_token, (B, 1, D))
    return jnp.concatenate([cls, x], axis=1)


if __name__ == "__main__":
    # Small, deterministic config.
    embed_dim = 32
    max_time_patches = 32
    max_freq_patches = 8
    batch = 2
    time_patches, freq_patches = 4, 2          # patch_shape
    num_patches = time_patches * freq_patches  # N = 8

    key = jax.random.PRNGKey(0)
    k_x, k_t, k_f, k_c = jax.random.split(key, 4)

    x = jax.random.normal(k_x, (batch, num_patches, embed_dim), dtype=jnp.float32)
    time_embed = jax.random.normal(k_t, (1, max_time_patches, embed_dim // 2), jnp.float32)
    freq_embed = jax.random.normal(k_f, (1, max_freq_patches, embed_dim // 2), jnp.float32)
    cls_token = jax.random.normal(k_c, (1, 1, embed_dim), jnp.float32)

    # Jit the whole wrapper so the pos-table glue fuses into a single XLA program
    # around the pallas_call (no extra per-step launches).
    fwd = jax.jit(positional_encoding_2d, static_argnums=(1,),
                  static_argnames=("max_time_patches", "max_freq_patches"))

    out = fwd(x, (time_patches, freq_patches), time_embed, freq_embed, cls_token,
              max_time_patches=max_time_patches, max_freq_patches=max_freq_patches)
    out = jax.block_until_ready(out)

    ref = _reference(
        x, (time_patches, freq_patches), time_embed, freq_embed, cls_token,
        max_time_patches=max_time_patches, max_freq_patches=max_freq_patches)

    assert out.shape == (batch, num_patches + 1, embed_dim), out.shape
    assert jnp.allclose(out, ref, atol=1e-6, rtol=1e-6), "mismatch vs reference"
    print("KERNEL_OK")
</pallas_src>

<mosaic_0001>
module attributes {stable_mosaic.version = 11 : i64} {
  func.func @_pos_enc_kernel(%arg0: i32, %arg1: memref<2x256xf32, #tpu.memory_space<vmem>>, %arg2: memref<1x256xf32, #tpu.memory_space<vmem>>, %arg3: memref<1x32xf32, #tpu.memory_space<vmem>>, %arg4: memref<2x288xf32, #tpu.memory_space<vmem>>) attributes {dimension_semantics = [#tpu.dimension_semantics<parallel>], iteration_bounds = array<i64: 1>, scalar_prefetch = 0 : i64, scratch_operands = 0 : i64, tpu.core_type = #tpu.core_type<tc>, window_params = [{transform_indices = @transform_0, window_bounds = array<i64: 2, 256>}, {pipeline_mode = #tpu.pipeline_mode<synchronous>, transform_indices = @transform_1, window_bounds = array<i64: 1, 256>}, {pipeline_mode = #tpu.pipeline_mode<synchronous>, transform_indices = @transform_2, window_bounds = array<i64: 1, 32>}, {transform_indices = @transform_3, window_bounds = array<i64: 2, 288>}]} {
    %c0 = arith.constant 0 : index
    %c0_0 = arith.constant 0 : index
    %0 = vector.load %arg1[%c0, %c0_0] : memref<2x256xf32, #tpu.memory_space<vmem>>, vector<2x256xf32>
    %c0_1 = arith.constant 0 : index
    %c0_2 = arith.constant 0 : index
    %1 = vector.load %arg2[%c0_1, %c0_2] : memref<1x256xf32, #tpu.memory_space<vmem>>, vector<1x256xf32>
    %2 = vector.broadcast %1 : vector<1x256xf32> to vector<2x256xf32>
    %3 = arith.addf %0, %2 : vector<2x256xf32>
    %c0_3 = arith.constant 0 : index
    %c0_4 = arith.constant 0 : index
    %4 = vector.load %arg3[%c0_3, %c0_4] : memref<1x32xf32, #tpu.memory_space<vmem>>, vector<1x32xf32>
    %5 = vector.shape_cast %4 : vector<1x32xf32> to vector<1x32xf32>
    %6 = vector.broadcast %5 : vector<1x32xf32> to vector<2x32xf32>
    %7 = tpu.concatenate %6, %3 in 1 : vector<2x32xf32>, vector<2x256xf32> -> vector<2x288xf32>
    %c0_5 = arith.constant 0 : index
    %c0_6 = arith.constant 0 : index
    %8 = vector.load %arg4[%c0_5, %c0_6] : memref<2x288xf32, #tpu.memory_space<vmem>>, vector<2x288xf32>
    tpu.vector_store %arg4[%c0_5, %c0_6], %7 {strides = array<i32>} : memref<2x288xf32, #tpu.memory_space<vmem>>, vector<2x288xf32>,
    return
  }
  func.func @transform_0(%arg0: i32) -> (i32, i32) {
    %c0_i32 = arith.constant 0 : i32
    %c0_i32_0 = arith.constant 0 : i32
    return %arg0, %c0_i32 : i32, i32
  }
  func.func @transform_1(%arg0: i32) -> (i32, i32) {
    %c0_i32 = arith.constant 0 : i32
    %c0_i32_0 = arith.constant 0 : i32
    %c0_i32_1 = arith.constant 0 : i32
    return %c0_i32, %c0_i32_0 : i32, i32
  }
  func.func @transform_2(%arg0: i32) -> (i32, i32) {
    %c0_i32 = arith.constant 0 : i32
    %c0_i32_0 = arith.constant 0 : i32
    %c0_i32_1 = arith.constant 0 : i32
    return %c0_i32, %c0_i32_0 : i32, i32
  }
  func.func @transform_3(%arg0: i32) -> (i32, i32) {
    %c0_i32 = arith.constant 0 : i32
    %c0_i32_0 = arith.constant 0 : i32
    return %arg0, %c0_i32 : i32, i32
  }
}

</mosaic_0001>

<bundles_post_ra>
// kernel: positional_encoding_2d.1
= control target key start
LH: loop header
LB: loop body
LE: loop exit
PB: predicated region body
PF: predicated region fallthrough
CT: control target
= control target key end

     0   :  { %v17_v0 = vlaneseq  ;;  %v90_v1 = vmov 1983009808   ;;  %s91_s16 = smov 32   ;;  %vm55_vm0 = vcmask 261120   ;;  %vm77_vm1 = vcmask 1041408   ;;  %s124_s1 = inlined_call_operand.vmem [shape: f32[1,256], index: 1, kind: input, shape index: {}]   ;;  %s125_s0 = inlined_call_operand.vmem [shape: f32[2,256], index: 0, kind: input, shape index: {}]   ;;  %s126_s2 = inlined_call_operand.vmem [shape: f32[1,32], index: 2, kind: input, shape index: {}]   ;;  %s127_s3 = inlined_call_operand.vmem [shape: f32[2,288], index: 3, kind: output, shape index: {}]  }
   0x1   :  { %v27_v2 = vunpack.c.l.s4 %v90_v1  ;;  %v15_v4 = vld [vmem:[%s124_s1] sm:$0x3]  ;;  %vm78_vm2 = vcmask 1043458   ;;  %vm80_vm4 = vcmask 259076  }
   0x2   :  { %v18_v3 = vshrl.u32 %v17_v0, 7  ;;  %v14_v12 = vld [vmem:[%s125_s0] sm:$0xf]  ;;  %vm79_vm3 = vmor %vm78_vm2, %vm77_vm1 }
   0x3   :  { %v28_v5 = vunpack.c.0.s8 %v27_v2  ;;  %v87_v18 = vld [vmem:[%s126_s2] ss:$0 sm:$0xff]  ;;  %vm81_vm5 = vmor %vm80_vm4, %vm79_vm3 }
   0x4   :  { %v19_v6 = vsub.s32 0, %v18_v3  ;;  %v23_v7 = vsub.s32 1, %v18_v3 }
   0x5   :  { %v31_v10 = vsub.s32 %v28_v5, %v18_v3 }
   0x6   :  { %v20_v8 = vrot.slane %v15_v4, %v19_v6  ;;  %v24_v9 = vrot.slane %v15_v4, %v23_v7 }
   0x8   :  { %v25_v11 = vcombine.low %v20_v8, %v24_v9 }
   0xa   :  { %v32_v13 = vrot.slane %v25_v11, %v31_v10 }
   0xc   :  { %v34_v14 = vadd.f32 %v32_v13, %v14_v12 }
   0xe   :  { %v49_v15 = vrot.slane %v34_v14, %v31_v10 }
  0x10   :  { %51 = vrot.lane.b32.xlu0 %v49_v15, %s91_s16  ;;  %v50_v16 = vcombine.high %v49_v15, %v49_v15 }
  0x14   :  { %53 = vrot.lane.b32.xlu0 %v50_v16, %s91_s16 }
  0x82   :  { %v52_v17 = vpop.permute.xlu0 %51 }
  0x83   :  { %v58_v20 = vsel %vm55_vm0, %v87_v18, %v52_v17 }
  0x86   :  { %v54_v19 = vpop.permute.xlu0 %53 }
  0x87   :  { %v56_v21 = vsel %vm55_vm0, %v52_v17, %v54_v19  ;;  %v74_v24 = vrot.slane %v54_v19, %v31_v10 }
  0x88   :  { %v60_v22 = vcombine.low %v58_v20, %v56_v21 }
  0x8a   :  { %v67_v23 = vrot.slane %v60_v22, %v31_v10 }
  0x8c   :  { %v75_v25 = vcombine.low %v67_v23, %v74_v24 }
  0x8e   :  { %82 = vst.msk [vmem:[%s127_s3] sm:$0x3f] %vm81_vm5, %v75_v25 }

</bundles_post_ra>
